<compile_context>
chip_gen: v7x
topology: tpu7x:2x2x1
jax: 0.10.0
libtpu: 0.0.40
codegen_flags: <defaults>
</compile_context>

<pallas_src>
import jax
import jax.numpy as jnp
from jax import lax
from jax.experimental import pallas as pl
from jax.experimental.pallas import tpu as pltpu

# ---------------- configuration (small synthetic sizes) ----------------
B = 2        # batch
S = 8        # sequence length
D = 32       # d_model
H = 4        # attention heads
DK = D // H  # head dim
DFF = 64     # feed-forward hidden
EPS = 1e-6
NEG_INF = -1e9


# ---------------- fused Pallas kernel (one batch element per grid step) ----
def _layernorm(x, alpha, bias):
    # x: (S, D); alpha/bias: (1, D); unbiased std, eps outside sqrt.
    mean = jnp.mean(x, axis=-1, keepdims=True)
    var = jnp.sum((x - mean) ** 2, axis=-1, keepdims=True) * (1.0 / (D - 1))
    inv = pl.reciprocal(jnp.sqrt(var) + EPS, approx=False)  # EUP, exact parity
    return alpha * (x - mean) * inv + bias


def encoder_block_kernel(x_ref, maskb_ref,
                         ln0_a_ref, ln0_b_ref,
                         wqkv_ref, bqkv_ref, wo_ref, bo_ref,
                         ln1_a_ref, ln1_b_ref,
                         w1_ref, b1_ref, w2_ref, b2_ref,
                         o_ref):
    f32 = jnp.float32
    bf16 = jnp.bfloat16

    x = x_ref[...]                                             # (S, D) f32

    # ---------- residual connection 0: pre-norm multi-head attention --------
    xn = _layernorm(x, ln0_a_ref[...], ln0_b_ref[...])
    qkv = jnp.dot(xn.astype(bf16), wqkv_ref[...],
                  preferred_element_type=f32) + bqkv_ref[...]  # (S, 3D) f32

    # heads stacked on a leading batch axis -> two batched matmuls + one
    # vectorized softmax (no VMEM scratch, no per-head masked stores)
    q3 = jnp.stack([qkv[:, 0 * D + h * DK:0 * D + (h + 1) * DK]
                    for h in range(H)], axis=0).astype(bf16)   # (H, S, DK)
    k3 = jnp.stack([qkv[:, 1 * D + h * DK:1 * D + (h + 1) * DK]
                    for h in range(H)], axis=0).astype(bf16)
    v3 = jnp.stack([qkv[:, 2 * D + h * DK:2 * D + (h + 1) * DK]
                    for h in range(H)], axis=0).astype(bf16)

    # batched QK^T; 1/sqrt(DK) already folded into Wq/bq; additive mask bias
    scores = jnp.einsum('hqd,hkd->hqk', q3, k3,
                        preferred_element_type=f32)            # (H, S, S)
    scores = scores + maskb_ref[...]                           # (1, S, S)

    m = jnp.max(scores, axis=-1, keepdims=True)
    e = jnp.exp(scores - m)
    p = e * pl.reciprocal(jnp.sum(e, axis=-1, keepdims=True), approx=False)

    ctx = jnp.einsum('hqk,hkd->hqd', p.astype(bf16), v3,
                     preferred_element_type=f32)               # (H, S, DK)
    # lane-concatenate head outputs in registers (32 lanes total)
    ctx2d = jnp.concatenate([ctx[h] for h in range(H)], axis=-1)  # (S, D)

    mha = jnp.dot(ctx2d.astype(bf16), wo_ref[...],
                  preferred_element_type=f32) + bo_ref[...]
    x1 = x + mha                                # residual add (dropout = id)

    # ---------- residual connection 1: pre-norm feed-forward ----------------
    xn1 = _layernorm(x1, ln1_a_ref[...], ln1_b_ref[...])
    hdn = jnp.dot(xn1.astype(bf16), w1_ref[...],
                  preferred_element_type=f32) + b1_ref[...]
    hdn = jnp.maximum(hdn, 0.0)                 # ReLU
    y = jnp.dot(hdn.astype(bf16), w2_ref[...],
                preferred_element_type=f32) + b2_ref[...]
    o_ref[...] = (x1 + y).astype(o_ref.dtype)   # residual add (dropout = id)


# ---------------- cost estimate ----------------
_FLOPS = (2 * B * S * D * 3 * D            # fused QKV projection
          + 2 * B * H * S * S * DK * 2     # QK^T and P@V
          + 2 * B * S * D * D              # output projection
          + 2 * B * S * D * DFF            # FFN up
          + 2 * B * S * DFF * D)           # FFN down
_TRANSCENDENTALS = B * H * S * S + 4 * B * S
_BYTES = (4 * (2 * B * S * D + B * S * S)               # x in/out + mask bias
          + 2 * (3 * D * D + D * D + D * DFF + DFF * D)  # bf16 weights
          + 4 * (3 * D + 3 * D + DFF + 4 * D))           # biases + LN params


# ---------------- one-time preparation (outside the hot path) --------------
def prepare_params(params, mask):
    """Fuse/cast weights and precompute the additive mask bias ONCE."""
    bf16 = jnp.bfloat16
    scale = 1.0 / (DK ** 0.5)                  # softmax scale folded into Wq/bq
    wqkv = jnp.concatenate(
        [params["wq"] * scale, params["wk"], params["wv"]], axis=1).astype(bf16)
    bqkv = jnp.concatenate(
        [params["bq"] * scale, params["bk"], params["bv"]], axis=1)
    mask_bias = jnp.where(mask > 0, 0.0, NEG_INF).astype(jnp.float32)
    return {
        "mask_bias": mask_bias.reshape(B, S, S),
        "ln0_a": params["ln0_a"], "ln0_b": params["ln0_b"],
        "wqkv": wqkv, "bqkv": bqkv,
        "wo": params["wo"].astype(bf16), "bo": params["bo"],
        "ln1_a": params["ln1_a"], "ln1_b": params["ln1_b"],
        "w1": params["w1"].astype(bf16), "b1": params["b1"],
        "w2": params["w2"].astype(bf16), "b2": params["b2"],
    }


# ---------------- jitted forward: a single pallas_call ----------------
@jax.jit
def encoder_block(x, prep):
    x2d = x.reshape(B * S, D)                  # fold batch into matmul M dim

    def wspec(shape):                          # whole-array (replicated) weight
        return pl.BlockSpec(shape, lambda b: (0,) * len(shape))

    out2d = pl.pallas_call(
        encoder_block_kernel,
        out_shape=jax.ShapeDtypeStruct((B * S, D), jnp.float32),
        grid_spec=pltpu.PrefetchScalarGridSpec(
            num_scalar_prefetch=0,
            grid=(B,),                                         # one batch / step
            in_specs=[
                pl.BlockSpec((S, D), lambda b: (b, 0)),        # x rows of batch b
                pl.BlockSpec((1, S, S), lambda b: (b, 0, 0)),  # additive mask
                wspec((1, D)), wspec((1, D)),                  # LN0 alpha/bias
                wspec((D, 3 * D)), wspec((1, 3 * D)),          # fused QKV
                wspec((D, D)), wspec((1, D)),                  # Wo / bo
                wspec((1, D)), wspec((1, D)),                  # LN1 alpha/bias
                wspec((D, DFF)), wspec((1, DFF)),              # FFN up
                wspec((DFF, D)), wspec((1, D)),                # FFN down
            ],
            out_specs=pl.BlockSpec((S, D), lambda b: (b, 0)),
        ),
        compiler_params=pltpu.CompilerParams(
            dimension_semantics=("parallel",)),   # shard batch across v7x TCs
        input_output_aliases={0: 0},              # in-place residual update of x
        cost_estimate=pl.CostEstimate(
            flops=_FLOPS,
            transcendentals=_TRANSCENDENTALS,
            bytes_accessed=_BYTES),
    )(x2d, prep["mask_bias"],
      prep["ln0_a"], prep["ln0_b"],
      prep["wqkv"], prep["bqkv"], prep["wo"], prep["bo"],
      prep["ln1_a"], prep["ln1_b"],
      prep["w1"], prep["b1"], prep["w2"], prep["b2"])
    return out2d.reshape(B, S, D)


def init_params(key):
    ks = jax.random.split(key, 8)
    scale = 0.02
    return {
        # LayerNormalization params (ones / zeros like PyTorch init)
        "ln0_a": jnp.ones((1, D), jnp.float32),
        "ln0_b": jnp.zeros((1, D), jnp.float32),
        "ln1_a": jnp.ones((1, D), jnp.float32),
        "ln1_b": jnp.zeros((1, D), jnp.float32),
        # MultiHeadAttention projections
        "wq": scale * jax.random.normal(ks[0], (D, D), jnp.float32),
        "bq": jnp.zeros((1, D), jnp.float32),
        "wk": scale * jax.random.normal(ks[1], (D, D), jnp.float32),
        "bk": jnp.zeros((1, D), jnp.float32),
        "wv": scale * jax.random.normal(ks[2], (D, D), jnp.float32),
        "bv": jnp.zeros((1, D), jnp.float32),
        "wo": scale * jax.random.normal(ks[3], (D, D), jnp.float32),
        "bo": jnp.zeros((1, D), jnp.float32),
        # FeedForwardBlock
        "w1": scale * jax.random.normal(ks[4], (D, DFF), jnp.float32),
        "b1": jnp.zeros((1, DFF), jnp.float32),
        "w2": scale * jax.random.normal(ks[5], (DFF, D), jnp.float32),
        "b2": jnp.zeros((1, D), jnp.float32),
    }


if __name__ == "__main__":
    key = jax.random.PRNGKey(0)
    kx, kp = jax.random.split(key)
    x = jax.random.normal(kx, (B, S, D), jnp.float32)
    mask = jnp.ones((B, 1, S, S), jnp.float32)   # all positions visible
    params = init_params(kp)

    prep = prepare_params(params, mask)          # one-time, outside hot path
    out = encoder_block(x, prep)
    jax.block_until_ready(out)

    assert out.shape == (B, S, D)
    assert jnp.all(jnp.isfinite(out))
    print("KERNEL_OK")
</pallas_src>

<mosaic_0001>
module attributes {stable_mosaic.version = 11 : i64} {
  func.func @encoder_block_kernel(%arg0: i32, %arg1: memref<8x32xf32, #tpu.memory_space<vmem>>, %arg2: memref<1x8x8xf32, #tpu.memory_space<vmem>>, %arg3: memref<1x32xf32, #tpu.memory_space<vmem>>, %arg4: memref<1x32xf32, #tpu.memory_space<vmem>>, %arg5: memref<32x96xbf16, #tpu.memory_space<vmem>>, %arg6: memref<1x96xf32, #tpu.memory_space<vmem>>, %arg7: memref<32x32xbf16, #tpu.memory_space<vmem>>, %arg8: memref<1x32xf32, #tpu.memory_space<vmem>>, %arg9: memref<1x32xf32, #tpu.memory_space<vmem>>, %arg10: memref<1x32xf32, #tpu.memory_space<vmem>>, %arg11: memref<32x64xbf16, #tpu.memory_space<vmem>>, %arg12: memref<1x64xf32, #tpu.memory_space<vmem>>, %arg13: memref<64x32xbf16, #tpu.memory_space<vmem>>, %arg14: memref<1x32xf32, #tpu.memory_space<vmem>>, %arg15: memref<8x32xf32, #tpu.memory_space<vmem>>) attributes {dimension_semantics = [#tpu.dimension_semantics<parallel>], iteration_bounds = array<i64: 2>, scalar_prefetch = 0 : i64, scratch_operands = 0 : i64, tpu.core_type = #tpu.core_type<tc>, window_params = [{transform_indices = @transform_0, window_bounds = array<i64: 8, 32>}, {transform_indices = @transform_1, window_bounds = array<i64: 1, 8, 8>}, {pipeline_mode = #tpu.pipeline_mode<synchronous>, transform_indices = @transform_2, window_bounds = array<i64: 1, 32>}, {pipeline_mode = #tpu.pipeline_mode<synchronous>, transform_indices = @transform_3, window_bounds = array<i64: 1, 32>}, {pipeline_mode = #tpu.pipeline_mode<synchronous>, transform_indices = @transform_4, window_bounds = array<i64: 32, 96>}, {pipeline_mode = #tpu.pipeline_mode<synchronous>, transform_indices = @transform_5, window_bounds = array<i64: 1, 96>}, {pipeline_mode = #tpu.pipeline_mode<synchronous>, transform_indices = @transform_6, window_bounds = array<i64: 32, 32>}, {pipeline_mode = #tpu.pipeline_mode<synchronous>, transform_indices = @transform_7, window_bounds = array<i64: 1, 32>}, {pipeline_mode = #tpu.pipeline_mode<synchronous>, transform_indices = @transform_8, window_bounds = array<i64: 1, 32>}, {pipeline_mode = #tpu.pipeline_mode<synchronous>, transform_indices = @transform_9, window_bounds = array<i64: 1, 32>}, {pipeline_mode = #tpu.pipeline_mode<synchronous>, transform_indices = @transform_10, window_bounds = array<i64: 32, 64>}, {pipeline_mode = #tpu.pipeline_mode<synchronous>, transform_indices = @transform_11, window_bounds = array<i64: 1, 64>}, {pipeline_mode = #tpu.pipeline_mode<synchronous>, transform_indices = @transform_12, window_bounds = array<i64: 64, 32>}, {pipeline_mode = #tpu.pipeline_mode<synchronous>, transform_indices = @transform_13, window_bounds = array<i64: 1, 32>}, {transform_indices = @transform_14, window_bounds = array<i64: 8, 32>}]} {
    %c0 = arith.constant 0 : index
    %c0_0 = arith.constant 0 : index
    %0 = vector.load %arg1[%c0, %c0_0] : memref<8x32xf32, #tpu.memory_space<vmem>>, vector<8x32xf32>
    %c0_1 = arith.constant 0 : index
    %c0_2 = arith.constant 0 : index
    %1 = vector.load %arg3[%c0_1, %c0_2] : memref<1x32xf32, #tpu.memory_space<vmem>>, vector<1x32xf32>
    %c0_3 = arith.constant 0 : index
    %c0_4 = arith.constant 0 : index
    %2 = vector.load %arg4[%c0_3, %c0_4] : memref<1x32xf32, #tpu.memory_space<vmem>>, vector<1x32xf32>
    %cst = arith.constant dense<0.000000e+00> : vector<8xf32>
    %3 = vector.multi_reduction <add>, %0, %cst [1] : vector<8x32xf32> to vector<8xf32>
    %4 = vector.shape_cast %3 : vector<8xf32> to vector<8x1xf32>
    %cst_5 = arith.constant 3.200000e+01 : f32
    %5 = vector.broadcast %cst_5 : f32 to vector<8x1xf32>
    %6 = arith.divf %4, %5 : vector<8x1xf32>
    %7 = vector.broadcast %6 : vector<8x1xf32> to vector<8x32xf32>
    %8 = arith.subf %0, %7 : vector<8x32xf32>
    %9 = arith.mulf %8, %8 : vector<8x32xf32>
    %cst_6 = arith.constant dense<0.000000e+00> : vector<8xf32>
    %10 = vector.multi_reduction <add>, %9, %cst_6 [1] : vector<8x32xf32> to vector<8xf32>
    %11 = vector.shape_cast %10 : vector<8xf32> to vector<8x1xf32>
    %cst_7 = arith.constant 0.0322580636 : f32
    %12 = vector.broadcast %cst_7 : f32 to vector<8x1xf32>
    %13 = arith.mulf %11, %12 : vector<8x1xf32>
    %14 = math.sqrt %13 : vector<8x1xf32>
    %cst_8 = arith.constant 9.99999997E-7 : f32
    %15 = vector.broadcast %cst_8 : f32 to vector<8x1xf32>
    %16 = arith.addf %14, %15 : vector<8x1xf32>
    %17 = tpu.reciprocal %16 : vector<8x1xf32> -> vector<8x1xf32>
    %18 = vector.broadcast %6 : vector<8x1xf32> to vector<8x32xf32>
    %19 = arith.subf %0, %18 : vector<8x32xf32>
    %20 = vector.broadcast %1 : vector<1x32xf32> to vector<8x32xf32>
    %21 = arith.mulf %20, %19 : vector<8x32xf32>
    %22 = vector.broadcast %17 : vector<8x1xf32> to vector<8x32xf32>
    %23 = arith.mulf %21, %22 : vector<8x32xf32>
    %24 = vector.broadcast %2 : vector<1x32xf32> to vector<8x32xf32>
    %25 = arith.addf %23, %24 : vector<8x32xf32>
    %26 = arith.truncf %25 : vector<8x32xf32> to vector<8x32xbf16>
    %c0_9 = arith.constant 0 : index
    %c0_10 = arith.constant 0 : index
    %27 = vector.load %arg5[%c0_9, %c0_10] : memref<32x96xbf16, #tpu.memory_space<vmem>>, vector<32x96xbf16>
    %cst_11 = arith.constant dense<0.000000e+00> : vector<8x96xf32>
    %28 = tpu.matmul %26, %27, %cst_11 {dimension_numbers = #tpu.dot_dimension_numbers<[1], [0], [0], [1], [0, 0, 1, 1], [], []>} : vector<8x32xbf16>, vector<32x96xbf16>, vector<8x96xf32> -> vector<8x96xf32>
    %c0_12 = arith.constant 0 : index
    %c0_13 = arith.constant 0 : index
    %29 = vector.load %arg6[%c0_12, %c0_13] : memref<1x96xf32, #tpu.memory_space<vmem>>, vector<1x96xf32>
    %30 = vector.broadcast %29 : vector<1x96xf32> to vector<8x96xf32>
    %31 = arith.addf %28, %30 : vector<8x96xf32>
    %32 = vector.extract_strided_slice %31 {offsets = [0, 0], sizes = [8, 8], strides = [1, 1]} : vector<8x96xf32> to vector<8x8xf32>
    %33 = vector.extract_strided_slice %31 {offsets = [0, 8], sizes = [8, 8], strides = [1, 1]} : vector<8x96xf32> to vector<8x8xf32>
    %34 = vector.extract_strided_slice %31 {offsets = [0, 16], sizes = [8, 8], strides = [1, 1]} : vector<8x96xf32> to vector<8x8xf32>
    %35 = vector.extract_strided_slice %31 {offsets = [0, 24], sizes = [8, 8], strides = [1, 1]} : vector<8x96xf32> to vector<8x8xf32>
    %36 = vector.shape_cast %32 : vector<8x8xf32> to vector<1x8x8xf32>
    %37 = vector.shape_cast %33 : vector<8x8xf32> to vector<1x8x8xf32>
    %38 = vector.shape_cast %34 : vector<8x8xf32> to vector<1x8x8xf32>
    %39 = vector.shape_cast %35 : vector<8x8xf32> to vector<1x8x8xf32>
    %40 = tpu.concatenate %36, %37, %38, %39 in 0 : vector<1x8x8xf32>, vector<1x8x8xf32>, vector<1x8x8xf32>, vector<1x8x8xf32> -> vector<4x8x8xf32>
    %41 = arith.truncf %40 : vector<4x8x8xf32> to vector<4x8x8xbf16>
    %42 = vector.extract_strided_slice %31 {offsets = [0, 32], sizes = [8, 8], strides = [1, 1]} : vector<8x96xf32> to vector<8x8xf32>
    %43 = vector.extract_strided_slice %31 {offsets = [0, 40], sizes = [8, 8], strides = [1, 1]} : vector<8x96xf32> to vector<8x8xf32>
    %44 = vector.extract_strided_slice %31 {offsets = [0, 48], sizes = [8, 8], strides = [1, 1]} : vector<8x96xf32> to vector<8x8xf32>
    %45 = vector.extract_strided_slice %31 {offsets = [0, 56], sizes = [8, 8], strides = [1, 1]} : vector<8x96xf32> to vector<8x8xf32>
    %46 = vector.shape_cast %42 : vector<8x8xf32> to vector<1x8x8xf32>
    %47 = vector.shape_cast %43 : vector<8x8xf32> to vector<1x8x8xf32>
    %48 = vector.shape_cast %44 : vector<8x8xf32> to vector<1x8x8xf32>
    %49 = vector.shape_cast %45 : vector<8x8xf32> to vector<1x8x8xf32>
    %50 = tpu.concatenate %46, %47, %48, %49 in 0 : vector<1x8x8xf32>, vector<1x8x8xf32>, vector<1x8x8xf32>, vector<1x8x8xf32> -> vector<4x8x8xf32>
    %51 = arith.truncf %50 : vector<4x8x8xf32> to vector<4x8x8xbf16>
    %52 = vector.extract_strided_slice %31 {offsets = [0, 64], sizes = [8, 8], strides = [1, 1]} : vector<8x96xf32> to vector<8x8xf32>
    %53 = vector.extract_strided_slice %31 {offsets = [0, 72], sizes = [8, 8], strides = [1, 1]} : vector<8x96xf32> to vector<8x8xf32>
    %54 = vector.extract_strided_slice %31 {offsets = [0, 80], sizes = [8, 8], strides = [1, 1]} : vector<8x96xf32> to vector<8x8xf32>
    %55 = vector.extract_strided_slice %31 {offsets = [0, 88], sizes = [8, 8], strides = [1, 1]} : vector<8x96xf32> to vector<8x8xf32>
    %56 = vector.shape_cast %52 : vector<8x8xf32> to vector<1x8x8xf32>
    %57 = vector.shape_cast %53 : vector<8x8xf32> to vector<1x8x8xf32>
    %58 = vector.shape_cast %54 : vector<8x8xf32> to vector<1x8x8xf32>
    %59 = vector.shape_cast %55 : vector<8x8xf32> to vector<1x8x8xf32>
    %60 = tpu.concatenate %56, %57, %58, %59 in 0 : vector<1x8x8xf32>, vector<1x8x8xf32>, vector<1x8x8xf32>, vector<1x8x8xf32> -> vector<4x8x8xf32>
    %61 = arith.truncf %60 : vector<4x8x8xf32> to vector<4x8x8xbf16>
    "tpu.trace_start"() <{level = 10 : i32, message = "hqd,hkd->hqk"}> : () -> ()
    %cst_14 = arith.constant dense<0.000000e+00> : vector<4x8x8xf32>
    %62 = tpu.matmul %41, %51, %cst_14 {dimension_numbers = #tpu.dot_dimension_numbers<[2], [2], [1], [1], [0, 0, 0, 1, 1, 1], [0], [0]>} : vector<4x8x8xbf16>, vector<4x8x8xbf16>, vector<4x8x8xf32> -> vector<4x8x8xf32>
    "tpu.trace_stop"() : () -> ()
    %c0_15 = arith.constant 0 : index
    %c0_16 = arith.constant 0 : index
    %c0_17 = arith.constant 0 : index
    %63 = vector.load %arg2[%c0_15, %c0_16, %c0_17] : memref<1x8x8xf32, #tpu.memory_space<vmem>>, vector<1x8x8xf32>
    %64 = vector.broadcast %63 : vector<1x8x8xf32> to vector<4x8x8xf32>
    %65 = arith.addf %62, %64 : vector<4x8x8xf32>
    %cst_18 = arith.constant dense<0xFF800000> : vector<4x8xf32>
    %66 = vector.multi_reduction <maximumf>, %65, %cst_18 [2] : vector<4x8x8xf32> to vector<4x8xf32>
    %67 = vector.shape_cast %66 : vector<4x8xf32> to vector<4x8x1xf32>
    %68 = vector.broadcast %67 : vector<4x8x1xf32> to vector<4x8x8xf32>
    %69 = arith.subf %65, %68 : vector<4x8x8xf32>
    %70 = math.exp %69 : vector<4x8x8xf32>
    %cst_19 = arith.constant dense<0.000000e+00> : vector<4x8xf32>
    %71 = vector.multi_reduction <add>, %70, %cst_19 [2] : vector<4x8x8xf32> to vector<4x8xf32>
    %72 = vector.shape_cast %71 : vector<4x8xf32> to vector<4x8x1xf32>
    %73 = tpu.reciprocal %72 : vector<4x8x1xf32> -> vector<4x8x1xf32>
    %74 = vector.broadcast %73 : vector<4x8x1xf32> to vector<4x8x8xf32>
    %75 = arith.mulf %70, %74 : vector<4x8x8xf32>
    %76 = arith.truncf %75 : vector<4x8x8xf32> to vector<4x8x8xbf16>
    "tpu.trace_start"() <{level = 10 : i32, message = "hqk,hkd->hqd"}> : () -> ()
    %cst_20 = arith.constant dense<0.000000e+00> : vector<4x8x8xf32>
    %77 = tpu.matmul %76, %61, %cst_20 {dimension_numbers = #tpu.dot_dimension_numbers<[2], [1], [1], [2], [0, 0, 0, 1, 1, 2], [0], [0]>} : vector<4x8x8xbf16>, vector<4x8x8xbf16>, vector<4x8x8xf32> -> vector<4x8x8xf32>
    "tpu.trace_stop"() : () -> ()
    %78 = vector.extract_strided_slice %77 {offsets = [0, 0, 0], sizes = [1, 8, 8], strides = [1, 1, 1]} : vector<4x8x8xf32> to vector<1x8x8xf32>
    %79 = vector.shape_cast %78 : vector<1x8x8xf32> to vector<8x8xf32>
    %80 = vector.extract_strided_slice %77 {offsets = [1, 0, 0], sizes = [1, 8, 8], strides = [1, 1, 1]} : vector<4x8x8xf32> to vector<1x8x8xf32>
    %81 = vector.shape_cast %80 : vector<1x8x8xf32> to vector<8x8xf32>
    %82 = vector.extract_strided_slice %77 {offsets = [2, 0, 0], sizes = [1, 8, 8], strides = [1, 1, 1]} : vector<4x8x8xf32> to vector<1x8x8xf32>
    %83 = vector.shape_cast %82 : vector<1x8x8xf32> to vector<8x8xf32>
    %84 = vector.extract_strided_slice %77 {offsets = [3, 0, 0], sizes = [1, 8, 8], strides = [1, 1, 1]} : vector<4x8x8xf32> to vector<1x8x8xf32>
    %85 = vector.shape_cast %84 : vector<1x8x8xf32> to vector<8x8xf32>
    %86 = tpu.concatenate %79, %81, %83, %85 in 1 : vector<8x8xf32>, vector<8x8xf32>, vector<8x8xf32>, vector<8x8xf32> -> vector<8x32xf32>
    %87 = arith.truncf %86 : vector<8x32xf32> to vector<8x32xbf16>
    %c0_21 = arith.constant 0 : index
    %c0_22 = arith.constant 0 : index
    %88 = vector.load %arg7[%c0_21, %c0_22] : memref<32x32xbf16, #tpu.memory_space<vmem>>, vector<32x32xbf16>
    %cst_23 = arith.constant dense<0.000000e+00> : vector<8x32xf32>
    %89 = tpu.matmul %87, %88, %cst_23 {dimension_numbers = #tpu.dot_dimension_numbers<[1], [0], [0], [1], [0, 0, 1, 1], [], []>} : vector<8x32xbf16>, vector<32x32xbf16>, vector<8x32xf32> -> vector<8x32xf32>
    %c0_24 = arith.constant 0 : index
    %c0_25 = arith.constant 0 : index
    %90 = vector.load %arg8[%c0_24, %c0_25] : memref<1x32xf32, #tpu.memory_space<vmem>>, vector<1x32xf32>
    %91 = vector.broadcast %90 : vector<1x32xf32> to vector<8x32xf32>
    %92 = arith.addf %89, %91 : vector<8x32xf32>
    %93 = arith.addf %0, %92 : vector<8x32xf32>
    %c0_26 = arith.constant 0 : index
    %c0_27 = arith.constant 0 : index
    %94 = vector.load %arg9[%c0_26, %c0_27] : memref<1x32xf32, #tpu.memory_space<vmem>>, vector<1x32xf32>
    %c0_28 = arith.constant 0 : index
    %c0_29 = arith.constant 0 : index
    %95 = vector.load %arg10[%c0_28, %c0_29] : memref<1x32xf32, #tpu.memory_space<vmem>>, vector<1x32xf32>
    %cst_30 = arith.constant dense<0.000000e+00> : vector<8xf32>
    %96 = vector.multi_reduction <add>, %93, %cst_30 [1] : vector<8x32xf32> to vector<8xf32>
    %97 = vector.shape_cast %96 : vector<8xf32> to vector<8x1xf32>
    %cst_31 = arith.constant 3.200000e+01 : f32
    %98 = vector.broadcast %cst_31 : f32 to vector<8x1xf32>
    %99 = arith.divf %97, %98 : vector<8x1xf32>
    %100 = vector.broadcast %99 : vector<8x1xf32> to vector<8x32xf32>
    %101 = arith.subf %93, %100 : vector<8x32xf32>
    %102 = arith.mulf %101, %101 : vector<8x32xf32>
    %cst_32 = arith.constant dense<0.000000e+00> : vector<8xf32>
    %103 = vector.multi_reduction <add>, %102, %cst_32 [1] : vector<8x32xf32> to vector<8xf32>
    %104 = vector.shape_cast %103 : vector<8xf32> to vector<8x1xf32>
    %cst_33 = arith.constant 0.0322580636 : f32
    %105 = vector.broadcast %cst_33 : f32 to vector<8x1xf32>
    %106 = arith.mulf %104, %105 : vector<8x1xf32>
    %107 = math.sqrt %106 : vector<8x1xf32>
    %cst_34 = arith.constant 9.99999997E-7 : f32
    %108 = vector.broadcast %cst_34 : f32 to vector<8x1xf32>
    %109 = arith.addf %107, %108 : vector<8x1xf32>
    %110 = tpu.reciprocal %109 : vector<8x1xf32> -> vector<8x1xf32>
    %111 = vector.broadcast %99 : vector<8x1xf32> to vector<8x32xf32>
    %112 = arith.subf %93, %111 : vector<8x32xf32>
    %113 = vector.broadcast %94 : vector<1x32xf32> to vector<8x32xf32>
    %114 = arith.mulf %113, %112 : vector<8x32xf32>
    %115 = vector.broadcast %110 : vector<8x1xf32> to vector<8x32xf32>
    %116 = arith.mulf %114, %115 : vector<8x32xf32>
    %117 = vector.broadcast %95 : vector<1x32xf32> to vector<8x32xf32>
    %118 = arith.addf %116, %117 : vector<8x32xf32>
    %119 = arith.truncf %118 : vector<8x32xf32> to vector<8x32xbf16>
    %c0_35 = arith.constant 0 : index
    %c0_36 = arith.constant 0 : index
    %120 = vector.load %arg11[%c0_35, %c0_36] : memref<32x64xbf16, #tpu.memory_space<vmem>>, vector<32x64xbf16>
    %cst_37 = arith.constant dense<0.000000e+00> : vector<8x64xf32>
    %121 = tpu.matmul %119, %120, %cst_37 {dimension_numbers = #tpu.dot_dimension_numbers<[1], [0], [0], [1], [0, 0, 1, 1], [], []>} : vector<8x32xbf16>, vector<32x64xbf16>, vector<8x64xf32> -> vector<8x64xf32>
    %c0_38 = arith.constant 0 : index
    %c0_39 = arith.constant 0 : index
    %122 = vector.load %arg12[%c0_38, %c0_39] : memref<1x64xf32, #tpu.memory_space<vmem>>, vector<1x64xf32>
    %123 = vector.broadcast %122 : vector<1x64xf32> to vector<8x64xf32>
    %124 = arith.addf %121, %123 : vector<8x64xf32>
    %cst_40 = arith.constant 0.000000e+00 : f32
    %125 = vector.broadcast %cst_40 : f32 to vector<8x64xf32>
    %126 = arith.maximumf %124, %125 : vector<8x64xf32>
    %127 = arith.truncf %126 : vector<8x64xf32> to vector<8x64xbf16>
    %c0_41 = arith.constant 0 : index
    %c0_42 = arith.constant 0 : index
    %128 = vector.load %arg13[%c0_41, %c0_42] : memref<64x32xbf16, #tpu.memory_space<vmem>>, vector<64x32xbf16>
    %cst_43 = arith.constant dense<0.000000e+00> : vector<8x32xf32>
    %129 = tpu.matmul %127, %128, %cst_43 {dimension_numbers = #tpu.dot_dimension_numbers<[1], [0], [0], [1], [0, 0, 1, 1], [], []>} : vector<8x64xbf16>, vector<64x32xbf16>, vector<8x32xf32> -> vector<8x32xf32>
    %c0_44 = arith.constant 0 : index
    %c0_45 = arith.constant 0 : index
    %130 = vector.load %arg14[%c0_44, %c0_45] : memref<1x32xf32, #tpu.memory_space<vmem>>, vector<1x32xf32>
    %131 = vector.broadcast %130 : vector<1x32xf32> to vector<8x32xf32>
    %132 = arith.addf %129, %131 : vector<8x32xf32>
    %133 = arith.addf %93, %132 : vector<8x32xf32>
    %c0_46 = arith.constant 0 : index
    %c0_47 = arith.constant 0 : index
    %134 = vector.load %arg15[%c0_46, %c0_47] : memref<8x32xf32, #tpu.memory_space<vmem>>, vector<8x32xf32>
    tpu.vector_store %arg15[%c0_46, %c0_47], %133 {strides = array<i32>} : memref<8x32xf32, #tpu.memory_space<vmem>>, vector<8x32xf32>,
    return
  }
  func.func @transform_0(%arg0: i32) -> (i32, i32) {
    %c0_i32 = arith.constant 0 : i32
    %c0_i32_0 = arith.constant 0 : i32
    return %arg0, %c0_i32 : i32, i32
  }
  func.func @transform_1(%arg0: i32) -> (i32, i32, i32) {
    %c0_i32 = arith.constant 0 : i32
    %c0_i32_0 = arith.constant 0 : i32
    %c0_i32_1 = arith.constant 0 : i32
    return %arg0, %c0_i32, %c0_i32_0 : i32, i32, i32
  }
  func.func @transform_2(%arg0: i32) -> (i32, i32) {
    %c0_i32 = arith.constant 0 : i32
    %c0_i32_0 = arith.constant 0 : i32
    %c0_i32_1 = arith.constant 0 : i32
    return %c0_i32, %c0_i32_0 : i32, i32
  }
  func.func @transform_3(%arg0: i32) -> (i32, i32) {
    %c0_i32 = arith.constant 0 : i32
    %c0_i32_0 = arith.constant 0 : i32
    %c0_i32_1 = arith.constant 0 : i32
    return %c0_i32, %c0_i32_0 : i32, i32
  }
  func.func @transform_4(%arg0: i32) -> (i32, i32) {
    %c0_i32 = arith.constant 0 : i32
    %c0_i32_0 = arith.constant 0 : i32
    %c0_i32_1 = arith.constant 0 : i32
    return %c0_i32, %c0_i32_0 : i32, i32
  }
  func.func @transform_5(%arg0: i32) -> (i32, i32) {
    %c0_i32 = arith.constant 0 : i32
    %c0_i32_0 = arith.constant 0 : i32
    %c0_i32_1 = arith.constant 0 : i32
    return %c0_i32, %c0_i32_0 : i32, i32
  }
  func.func @transform_6(%arg0: i32) -> (i32, i32) {
    %c0_i32 = arith.constant 0 : i32
    %c0_i32_0 = arith.constant 0 : i32
    %c0_i32_1 = arith.constant 0 : i32
    return %c0_i32, %c0_i32_0 : i32, i32
  }
  func.func @transform_7(%arg0: i32) -> (i32, i32) {
    %c0_i32 = arith.constant 0 : i32
    %c0_i32_0 = arith.constant 0 : i32
    %c0_i32_1 = arith.constant 0 : i32
    return %c0_i32, %c0_i32_0 : i32, i32
  }
  func.func @transform_8(%arg0: i32) -> (i32, i32) {
    %c0_i32 = arith.constant 0 : i32
    %c0_i32_0 = arith.constant 0 : i32
    %c0_i32_1 = arith.constant 0 : i32
    return %c0_i32, %c0_i32_0 : i32, i32
  }
  func.func @transform_9(%arg0: i32) -> (i32, i32) {
    %c0_i32 = arith.constant 0 : i32
    %c0_i32_0 = arith.constant 0 : i32
    %c0_i32_1 = arith.constant 0 : i32
    return %c0_i32, %c0_i32_0 : i32, i32
  }
  func.func @transform_10(%arg0: i32) -> (i32, i32) {
    %c0_i32 = arith.constant 0 : i32
    %c0_i32_0 = arith.constant 0 : i32
    %c0_i32_1 = arith.constant 0 : i32
    return %c0_i32, %c0_i32_0 : i32, i32
  }
  func.func @transform_11(%arg0: i32) -> (i32, i32) {
    %c0_i32 = arith.constant 0 : i32
    %c0_i32_0 = arith.constant 0 : i32
    %c0_i32_1 = arith.constant 0 : i32
    return %c0_i32, %c0_i32_0 : i32, i32
  }
  func.func @transform_12(%arg0: i32) -> (i32, i32) {
    %c0_i32 = arith.constant 0 : i32
    %c0_i32_0 = arith.constant 0 : i32
    %c0_i32_1 = arith.constant 0 : i32
    return %c0_i32, %c0_i32_0 : i32, i32
  }
  func.func @transform_13(%arg0: i32) -> (i32, i32) {
    %c0_i32 = arith.constant 0 : i32
    %c0_i32_0 = arith.constant 0 : i32
    %c0_i32_1 = arith.constant 0 : i32
    return %c0_i32, %c0_i32_0 : i32, i32
  }
  func.func @transform_14(%arg0: i32) -> (i32, i32) {
    %c0_i32 = arith.constant 0 : i32
    %c0_i32_0 = arith.constant 0 : i32
    return %arg0, %c0_i32 : i32, i32
  }
}

</mosaic_0001>

<bundles_post_ra>
// kernel: encoder_block.1
= control target key start
LH: loop header
LB: loop body
LE: loop exit
PB: predicated region body
PF: predicated region fallthrough
CT: control target
= control target key end

     0   :  { %s2252_s0 = inlined_call_operand.vmem [shape: f32[16,32], index: 0, kind: input, shape index: {}, may-alias: {0,14}]   ;;  %s2253_s1 = inlined_call_operand.vmem [shape: f32[2,8,8], index: 1, kind: input, shape index: {}]   ;;  %s2254_s2 = inlined_call_operand.vmem [shape: f32[1,32], index: 2, kind: input, shape index: {}]   ;;  %s2255_s3 = inlined_call_operand.vmem [shape: f32[1,32], index: 3, kind: input, shape index: {}]   ;;  %s2256_s4 = inlined_call_operand.vmem [shape: bf16[32,96], index: 4, kind: input, shape index: {}]   ;;  %s2257_s5 = inlined_call_operand.hbm [shape: f32[1,96], index: 5, kind: input, shape index: {}]   ;;  %s2258_s6 = inlined_call_operand.vmem [shape: bf16[32,32], index: 6, kind: input, shape index: {}]   ;;  %s2259_s7 = inlined_call_operand.hbm [shape: f32[1,32], index: 7, kind: input, shape index: {}]   ;;  %s2260_s8 = inlined_call_operand.vmem [shape: f32[1,32], index: 8, kind: input, shape index: {}]   ;;  %s2261_s9 = inlined_call_operand.vmem [shape: f32[1,32], index: 9, kind: input, shape index: {}]   ;;  %s2262_s10 = inlined_call_operand.vmem [shape: bf16[32,64], index: 10, kind: input, shape index: {}]   ;;  %s2263_s11 = inlined_call_operand.hbm [shape: f32[1,64], index: 11, kind: input, shape index: {}]   ;;  %s2264_s12 = inlined_call_operand.vmem [shape: bf16[64,32], index: 12, kind: input, shape index: {}]   ;;  %s2265_s13 = inlined_call_operand.hbm [shape: f32[1,32], index: 13, kind: input, shape index: {}]   ;;  %s2266_s14 = inlined_call_operand.vmem [shape: f32[16,32], index: 14, kind: output, shape index: {}, may-alias: {0,14}]  }
   0x1   :  { %2270 = sst [smem:[#allocation13_spill]] %s2266_s14 }
   0x2   :  { %19 = vsyncpa [#allocation3], 0 }
   0x3   :  { %20 = vsyncpa [#allocation5], 0 }
   0x4   :  { %21 = vsyncpa [#allocation8], 0  ;;  %s1948_s29 = smov 0  }
   0x5 LB: > { %2271 = sst [smem:[#allocation12_spill]] %s1857_s29  ;;  %s1954_s30 = sadd.s32 4294967295, %s1857_s29   ;;  %s1857_s29 = sphi %s1948_s29, %s27_s29  }
   0x6   : > { %p1474_p0 = scmp.ge.s32.totalorder %s1857_s29, 1  ;;  %p362_p1 = scmp.lt.s32.totalorder %s1857_s29, 3 }
   0x7   : > { %p2267_p2 = scmp.eq.s32.totalorder %s1954_s30, 0  ;;  %s1859_s15 = smov [#allocation4]  }
   0x8   : > { %s398_s16 = sshll.u32 %s1859_s15, 4  ;;  %p1959_p3 = pnand %p1474_p0, %p362_p1  ;;  %s399_s16 = int_to_ptr.vmem [resolvable:$true] %s398_s16 }
   0x9   : > { %s1860_s18 = smov [#allocation2]   ;;  %s1861_s20 = smov [#allocation6]  }
   0xa   : > { %s2272_s17 = scalar_select %p1959_p3, 1, 0 }
   0xb   : > { %s384_s19 = sshll.u32 %s1860_s18, 4  ;;  %p1650_p4 = pneg %p1959_p3  ;;  %s1971_s19 = int_to_ptr.vmem [resolvable:$true] %s384_s19 }
   0xc   : > { %s418_s21 = sshll.u32 %s1861_s20, 4  ;;  %s1862_s23 = smov [#allocation7]   ;;  %s1973_s21 = int_to_ptr.vmem [resolvable:$true] %s418_s21 }
   0xd   : > { %p1967_p5 = pnand %p2267_p2, %p1650_p4  ;;  %s432_s24 = sshll.u32 %s1862_s23, 4  ;;  %s1975_s24 = int_to_ptr.vmem [resolvable:$true] %s432_s24 }
   0xe   : > { %s1727_s27 = scalar_lea.hbm %s2259_s7, 16 }
   0xf   : > { %p1728_p6 = scmp.ne.s32.totalorder %s2259_s7, %s1727_s27  ;;  %p1985_p7 = pneg %p1967_p5 }
  0x10   : > { %p1734_p10 = scmp.lt.u32.totalorder %s1727_s27, %s2259_s7 }
  0x11   : > { %p1730_p8 = pnand %p1985_p7, %p1728_p6 }
  0x13   : > { %p1731_p9 = pneg %p1730_p8 }
  0x15   : > { %p1736_p11 = pnand %p1734_p10, %p1731_p9 }
  0x17   : > { %1739 = shalt.err (!%p1736_p11)
}
  0x18   : > { %s1740_s25 = scalar_lea.vmem %s399_s16, 16  ;;  %s1747_s26 = scalar_lea.vmem %s399_s16, 32 }
  0x19   : > { %p1741_p12 = scmp.ne.s32.totalorder %s399_s16, %s1740_s25  ;;  %p1748_p1 = scmp.lt.s32.totalorder %s399_s16, %s399_s16 }
  0x1a   : > { %p1749_p4 = scmp.lt.s32.totalorder %s1747_s26, %s1740_s25 }
  0x1b   : > { %p1743_p13 = pnand %p1741_p12, %p1985_p7 }
  0x1c   : > { %p1750_p2 = por %p1749_p4, %p1748_p1 }
  0x1d   : > { %p1744_p0 = pneg %p1743_p13 }
  0x1f   : > { %p1751_p3 = pnand %p1750_p2, %p1744_p0 }
  0x21   : > { %1754 = shalt.err (!%p1751_p3)
}
  0x22   : > { %1656 = dma.hbm_to_vmem [thread:$0]  (!%p1967_p5), %s2259_s7, 16, %s399_s16, [#allocation5]  }
  0x23   : > { %s1755_s23 = scalar_lea.hbm %s2257_s5, 16 }
  0x24   : > { %p1756_p6 = scmp.ne.s32.totalorder %s2257_s5, %s1755_s23  ;;  %p1762_p2 = scmp.lt.u32.totalorder %s1755_s23, %s2257_s5 }
  0x26   : > { %p1758_p8 = pnand %p1756_p6, %p1985_p7 }
  0x28   : > { %p1759_p9 = pneg %p1758_p8 }
  0x2a   : > { %p1764_p3 = pnand %p1762_p2, %p1759_p9 }
  0x2c   : > { %1767 = shalt.err (!%p1764_p3)
}
  0x2d   : > { %s1768_s16 = scalar_lea.vmem %s1971_s19, 16  ;;  %s1775_s14 = scalar_lea.vmem %s1971_s19, 32 }
  0x2e   : > { %p1769_p10 = scmp.ne.s32.totalorder %s1971_s19, %s1768_s16  ;;  %p1776_p13 = scmp.lt.s32.totalorder %s1971_s19, %s1971_s19 }
  0x2f   : > { %p1777_p0 = scmp.lt.s32.totalorder %s1775_s14, %s1768_s16 }
  0x30   : > { %p1771_p11 = pnand %p1769_p10, %p1985_p7 }
  0x31   : > { %p1778_p1 = por %p1777_p0, %p1776_p13 }
  0x32   : > { %p1772_p12 = pneg %p1771_p11 }
  0x34   : > { %p1779_p4 = pnand %p1778_p1, %p1772_p12 }
  0x36   : > { %1782 = shalt.err (!%p1779_p4)
}
  0x37   : > { %1653 = dma.hbm_to_vmem [thread:$0]  (!%p1967_p5), %s2257_s5, 16, %s1971_s19, [#allocation3]  }
  0x38   : > { %s1783_s20 = scalar_lea.hbm %s2263_s11, 16 }
  0x39   : > { %p1784_p6 = scmp.ne.s32.totalorder %s2263_s11, %s1783_s20  ;;  %p1790_p2 = scmp.lt.u32.totalorder %s1783_s20, %s2263_s11 }
  0x3b   : > { %p1786_p8 = pnand %p1784_p6, %p1985_p7 }
  0x3d   : > { %p1787_p9 = pneg %p1786_p8 }
  0x3f   : > { %p1792_p3 = pnand %p1790_p2, %p1787_p9 }
  0x41   : > { %1795 = shalt.err (!%p1792_p3)
}
  0x42   : > { %s1796_s19 = scalar_lea.vmem %s1973_s21, 16  ;;  %s1803_s14 = scalar_lea.vmem %s1973_s21, 32 }
  0x43   : > { %p1797_p10 = scmp.ne.s32.totalorder %s1973_s21, %s1796_s19  ;;  %p1804_p13 = scmp.lt.s32.totalorder %s1973_s21, %s1973_s21 }
  0x44   : > { %p1805_p0 = scmp.lt.s32.totalorder %s1803_s14, %s1796_s19 }
  0x45   : > { %p1799_p11 = pnand %p1797_p10, %p1985_p7 }
  0x46   : > { %p1806_p1 = por %p1805_p0, %p1804_p13 }
  0x47   : > { %p1800_p12 = pneg %p1799_p11 }
  0x49   : > { %p1807_p4 = pnand %p1806_p1, %p1800_p12 }
  0x4b   : > { %1810 = shalt.err (!%p1807_p4)
}
  0x4c   : > { %1659 = dma.hbm_to_vmem [thread:$0]  (!%p1967_p5), %s2263_s11, 16, %s1973_s21, [#allocation5]  }
  0x4d   : > { %s1811_s20 = scalar_lea.hbm %s2265_s13, 16 }
  0x4e   : > { %p1812_p6 = scmp.ne.s32.totalorder %s2265_s13, %s1811_s20  ;;  %p1818_p2 = scmp.lt.u32.totalorder %s1811_s20, %s2265_s13 }
  0x50   : > { %p1814_p8 = pnand %p1812_p6, %p1985_p7 }
  0x52   : > { %p1815_p9 = pneg %p1814_p8 }
  0x54   : > { %p1820_p3 = pnand %p1818_p2, %p1815_p9 }
  0x56   : > { %1823 = shalt.err (!%p1820_p3)
}
  0x57   : > { %s1824_s21 = scalar_lea.vmem %s1975_s24, 16  ;;  %s1831_s19 = scalar_lea.vmem %s1975_s24, 32 }
  0x58   : > { %p1825_p10 = scmp.ne.s32.totalorder %s1975_s24, %s1824_s21  ;;  %p1832_p13 = scmp.lt.s32.totalorder %s1975_s24, %s1975_s24 }
  0x59   : > { %p1833_p0 = scmp.lt.s32.totalorder %s1831_s19, %s1824_s21 }
  0x5a   : > { %p1827_p11 = pnand %p1825_p10, %p1985_p7 }
  0x5b   : > { %p1834_p1 = por %p1833_p0, %p1832_p13 }
  0x5c   : > { %p1828_p12 = pneg %p1827_p11 }
  0x5e   : > { %p1835_p4 = pnand %p1834_p1, %p1828_p12 }
  0x60   : > { %1838 = shalt.err (!%p1835_p4)
}
  0x61   : > { %1662 = dma.hbm_to_vmem [thread:$0]  (!%p1967_p5), %s2265_s13, 16, %s1975_s24, [#allocation8]  }
  0x62   : > { %p2275_p6 = scmp.ne.s32.totalorder %s2272_s17, 0 }
  0x63   : > { %p2276_p7 = scmp.eq.s32.totalorder (!%p2275_p6), %s1954_s30, 0 }
  0x64   : > { %459 = sbr.rel (%p2275_p6) target bundleno = 2751 (0xabf), region = 76 }
  0x6b   : > { %1844 = dma.done.wait (%p2276_p7), [#allocation3], 16   ;;  %p2277_p8 = pmov %p2276_p7 }
  0x6c   : > { %p2278_p9 = pmov %p2276_p7 }
  0x6d   : > { %1846 = vsyncadd (%p2277_p8), [#allocation3], 4294967280 }
  0x6e   : > { %1848 = dma.done.wait (%p2278_p9), [#allocation5], 32   ;;  %p2279_p2 = pmov %p2276_p7 }
  0x70   : > { %1850 = vsyncadd (%p2279_p2), [#allocation5], 4294967264  ;;  %p2280_p3 = pmov %p2279_p2 }
  0x71   : > { %p2281_p5 = pmov %p2279_p2 }
  0x72   : > { %1852 = dma.done.wait (%p2280_p3), [#allocation8], 16  }
  0x73   : > { %1854 = vsyncadd (%p2281_p5), [#allocation8], 4294967280  ;;  %p519_p10 = scmp.lt.s32.totalorder %s1954_s30, 1  ;;  %vm535_vm0 = vcmask 261120   ;;  %v1693_v7 = vld [vmem:[%s2256_s4] sm:$0xff]   ;;  %v1863_v8 = vmov 0.0  }
  0x74   : > { %1550 = vmatprep.subr.bf16.mxu0 %v1863_v8  ;;  %vm1864_vm1 = vmmov 0   ;;  %v1694_v9 = vld [vmem:[%s2256_s4 + $0x8] sm:$0xff]   ;;  %1558 = vmatprep.subr.bf16.mxu1 %v1863_v8  ;;  %v1488_v18 = vld [vmem:[%s2254_s2] ss:$0 sm:$0xff]  ;;  %s1865_s16 = smov 104   ;;  %s1866_s21 = smov 120  }
  0x75   : > { %s2285_s30 = smov (!%p519_p10, %s1954_s30), 1  ;;  %1554 = vmatprep.mubr.msk.bf16.mxu0 %vm1864_vm1, %v1863_v8  ;;  %1551 = vmatpush3.bf16.msra.mxu0 %v1693_v7  ;;  %v1489_v21 = vld [vmem:[%s2255_s3] ss:$0 sm:$0xff]  ;;  %s1867_s19 = smov 112   ;;  %vm656_vm4 = vcmask 64512   ;;  %vm903_vm5 = vcmask 1043456  }
  0x76   : > { %s2089_s17 = sshll.u32 %s2285_s30, 3  ;;  %1552 = vmatprep.subr.bf16.mxu0 %v1863_v8  ;;  %1560 = vmatprep.mubr.msk.bf16.mxu1 %vm1864_vm1, %v1863_v8  ;;  %v1490_v25 = vld [vmem:[#allocation2] ss:$0 sm:$0xff]  ;;  %s1868_s14 = smov 96   ;;  %vm1104_vm6 = vcmask 130048   ;;  %vm1106_vm7 = vcmask 195584  }
  0x77   : > { %s522_s18 = scalar_lea.vmem %s2252_s0, %s2089_s17  ;;  %s526_s24 = scalar_lea.vmem %s2253_s1, %s2089_s17  ;;  %vm1320_vm10 = vcmask 523264  }
  0x78   : > { %v2095_v0 = vld [vmem:[%s522_s18] sm:$0xff]  ;;  %s1869_s18 = smov 64   ;;  %s1870_s20 = smov 8  }
  0x79   : > { %v536_v1 = vsel %vm535_vm0, %v2095_v0, 0.0  ;;  %1553 = vmatpush3.bf16.msra.mxu0 %v1694_v9  ;;  %v652_v46 = vld [vmem:[%s526_s24] sm:$0xff]  ;;  %s1871_s23 = smov 16   ;;  %s1872_s25 = smov 24  }
  0x7a   : > { %537 = vadd.xlane.f32.xlu0 %v536_v1  ;;  %1564 = vmatprep.subr.bf16.mxu0 %v1863_v8 }
 0x107   : > { %v538_v2 = vpop.xlane.xlu0 %537 }
 0x108   : > { %v540_v3 = vmul.f32 0.03125, %v538_v2 }
 0x10a   : > { %v541_v4 = vsub.f32 %v2095_v0, %v540_v3 }
 0x10c   : > { %v542_v5 = vmul.f32 %v541_v4, %v541_v4  ;;  %v562_v19 = vmul.f32 %v1488_v18, %v541_v4 }
 0x10e   : > { %v543_v6 = vsel %vm535_vm0, %v542_v5, 0.0 }
 0x10f   : > { %544 = vadd.xlane.f32.xlu0 %v543_v6 }
 0x19c   : > { %v545_v10 = vpop.xlane.xlu0 %544 }
 0x19d   : > { %v546_v11 = vmul.f32 0.032258064, %v545_v10 }
 0x19f   : > { %1703 = vrsqrt.f32 %v546_v11  ;;  %vm549_vm2 = vcmp.eq.f32.partialorder %v546_v11, inf  ;;  %v552_v14 = vand.u32 2147483648, %v546_v11  ;;  %vm551_vm3 = vcmp.eq.f32.partialorder %v546_v11, 0.0 }
 0x1a9   : > { %v1704_v12 = vpop.eup %1703 }
 0x1aa   : > { %v548_v13 = vmul.f32 %v1704_v12, %v546_v11 }
 0x1ac   : > { %v550_v15 = vsel %vm549_vm2, %v546_v11, %v548_v13 }
 0x1ad   : > { %v553_v16 = vsel %vm551_vm3, %v552_v14, %v550_v15 }
 0x1ae   : > { %v554_v17 = vadd.f32 1e-06, %v553_v16 }
 0x1b0   : > { %1705 = vrcp.f32 %v554_v17 }
 0x1ba   : > { %v1706_v20 = vpop.eup %1705 }
 0x1bb   : > { %v563_v22 = vmul.f32 %v1706_v20, %v562_v19 }
 0x1bd   : > { %v570_v23 = vadd.f32 %v1489_v21, %v563_v22 }
 0x1bf   : > { %v571_v24 = vpack.c.bf16 %v570_v23, %v570_v23 }
 0x1c1   : > { %1555 = vmatmul.mubr.msk.bf16.vlgmr.msra.gmra.mrb[0].mxu0 %vm535_vm0, %v571_v24 }
 0x1c2   : > { %1566 = vmatprep.mubr.msk.bf16.mxu0 %vm1864_vm1, %v1863_v8 }
 0x294   : > { %v632_v26 = vpop.f32.mrb[0].mxu0 }
 0x295   : > { %v633_v27 = vadd.f32 %v1490_v25, %v632_v26  ;;  %v1556_v28 = vpop.f32.mrb[1].mxu0 }
 0x296   : > { %v635_v29 = vpop.f32.mrb[2].mxu0 }
 0x297   : > { %645 = vrot.lane.b32.xlu0 %v633_v27, %s1865_s16  ;;  %639 = vrot.lane.b32.xlu1 %v633_v27, %s1866_s21  ;;  %v1557_v30 = vpop.f32.mrb[3].mxu0  ;;  %v2124_v31 = vpack.c.bf16 %v633_v27, %v633_v27  ;;  %s2282_s21 = sld [smem:[#allocation13_spill]] }
 0x29b   : > { %642 = vrot.lane.b32.xlu1 %v633_v27, %s1867_s19 }
 0x29d   : > { %s530_s19 = scalar_lea.vmem %s2282_s21, %s2089_s17 }
 0x29f   : > { %654 = vrot.lane.b32.xlu1 %v2124_v31, %s1868_s14 }
 0x309   : > { %v640_v32 = vpop.permute.xlu1 %639  ;;  %v646_v36 = vpop.permute.xlu0 %645 }
 0x30a   : > { %v2127_v33 = vpack.c.bf16 %v640_v32, %v640_v32  ;;  %v2133_v38 = vpack.c.bf16 %v646_v36, %v646_v36 }
 0x30c   : > { %704 = vrot.lane.b32.xlu1 %v2127_v33, %s1868_s14 }
 0x30d   : > { %v643_v34 = vpop.permute.xlu1 %642 }
 0x30e   : > { %v2130_v35 = vpack.c.bf16 %v643_v34, %v643_v34 }
 0x310   : > { %753 = vrot.lane.b32.xlu1 %v2130_v35, %s1868_s14 }
 0x311   : > { %v655_v37 = vpop.permute.xlu1 %654 }
 0x312   : > { %v661_v39 = vsel %vm656_vm4, %v655_v37, 0 }
 0x313   : > { %1559 = vmatpush3.bf16.xpose.msra.mxu1 %v661_v39 }
 0x314   : > { %802 = vrot.lane.b32.xlu1 %v2133_v38, %s1868_s14  ;;  %1570 = vmatprep.subr.bf16.mxu1 %v1863_v8 }
 0x31a   : > { %1561 = vmatmul.mubr.msk.bf16.vlgmr.msra.gmra.mrb[0].mxu1 %vm656_vm4, %v2124_v31 }
 0x31b   : > { %1572 = vmatprep.mubr.msk.bf16.mxu1 %vm1864_vm1, %v1863_v8 }
 0x37e   : > { %v705_v40 = vpop.permute.xlu1 %704 }
 0x37f   : > { %v710_v41 = vsel %vm656_vm4, %v705_v40, 0 }
 0x380   : > { %1565 = vmatpush3.bf16.xpose.msra.mxu0 %v710_v41 }
 0x381   : > { %1576 = vmatprep.subr.bf16.mxu0 %v1863_v8 }
 0x382   : > { %v754_v42 = vpop.permute.xlu1 %753 }
 0x383   : > { %v759_v43 = vsel %vm656_vm4, %v754_v42, 0 }
 0x384   : > { %1571 = vmatpush3.bf16.xpose.msra.mxu1 %v759_v43 }
 0x385   : > { %1582 = vmatprep.subr.bf16.mxu1 %v1863_v8 }
 0x386   : > { %v803_v44 = vpop.permute.xlu1 %802 }
 0x387   : > { %v808_v45 = vsel %vm656_vm4, %v803_v44, 0  ;;  %1567 = vmatmul.mubr.msk.bf16.vlgmr.msra.gmra.mrb[4].mxu0 %vm656_vm4, %v2127_v33 }
 0x388   : > { %1577 = vmatpush3.bf16.xpose.msra.mxu0 %v808_v45  ;;  %1578 = vmatprep.mubr.msk.bf16.mxu0 %vm1864_vm1, %v1863_v8 }
 0x389   : > { %1588 = vmatprep.subr.bf16.mxu0 %v1863_v8 }
 0x38b   : > { %1573 = vmatmul.mubr.msk.bf16.vlgmr.msra.gmra.mrb[4].mxu1 %vm656_vm4, %v2130_v35 }
 0x38c   : > { %1584 = vmatprep.mubr.msk.bf16.mxu1 %vm1864_vm1, %v1863_v8 }
 0x38f   : > { %1579 = vmatmul.mubr.msk.bf16.vlgmr.msra.gmra.mrb[8].mxu0 %vm656_vm4, %v2133_v38 }
 0x390   : > { %1590 = vmatprep.mubr.msk.bf16.mxu0 %vm1864_vm1, %v1863_v8 }
 0x3ed   : > { %v697_v47 = vpop.f32.mrb[0].mxu1 }
 0x3ee   : > { %v698_v48 = vadd.f32 %v697_v47, %v652_v46  ;;  %v1562_v49 = vpop.f32.mrb[1].mxu1 }
 0x3ef   : > { %v700_v50 = vpop.f32.mrb[2].mxu1 }
 0x3f0   : > { %v1563_v51 = vpop.f32.mrb[3].mxu1  ;;  %v850_v52 = vsel %vm656_vm4, %v698_v48, -inf }
 0x3f1   : > { %851 = vmax.xlane.f32.xlu1 %v850_v52 }
 0x45a   : > { %v746_v53 = vpop.f32.mrb[4].mxu0 }
 0x45b   : > { %v747_v54 = vadd.f32 %v746_v53, %v652_v46  ;;  %v1568_v55 = vpop.f32.mrb[5].mxu0 }
 0x45c   : > { %v749_v56 = vpop.f32.mrb[6].mxu0 }
 0x45d   : > { %v1569_v57 = vpop.f32.mrb[7].mxu0  ;;  %v853_v58 = vsel %vm656_vm4, %v747_v54, -inf }
 0x45e   : > { %v795_v59 = vpop.f32.mrb[4].mxu1  ;;  %854 = vmax.xlane.f32.xlu0 %v853_v58  ;;  %v1695_v57 = vld [vmem:[%s2258_s6] sm:$0xff]   ;;  %v1696_v58 = vld [vmem:[%s2258_s6 + $0x8] sm:$0xff]  }
 0x45f   : > { %v796_v60 = vadd.f32 %v795_v59, %v652_v46  ;;  %v1574_v61 = vpop.f32.mrb[5].mxu1 }
 0x460   : > { %v798_v62 = vpop.f32.mrb[6].mxu1 }
 0x461   : > { %v1575_v63 = vpop.f32.mrb[7].mxu1  ;;  %v856_v1 = vsel %vm656_vm4, %v796_v60, -inf }
 0x462   : > { %857 = vmax.xlane.f32.xlu1 %v856_v1  ;;  %v844_v2 = vpop.f32.mrb[8].mxu0 }
 0x463   : > { %v845_v3 = vadd.f32 %v844_v2, %v652_v46  ;;  %v1580_v4 = vpop.f32.mrb[9].mxu0 }
 0x464   : > { %v847_v5 = vpop.f32.mrb[10].mxu0 }
 0x465   : > { %v1581_v6 = vpop.f32.mrb[11].mxu0  ;;  %v859_v7 = vsel %vm656_vm4, %v845_v3, -inf }
 0x466   : > { %860 = vmax.xlane.f32.xlu0 %v859_v7 }
 0x473   : > { %898 = vrot.lane.b32.xlu1 %v2124_v31, %s1869_s18 }
 0x47e   : > { %v852_v9 = vpop.xlane.xlu1 %851 }
 0x47f   : > { %v862_v10 = vsub.f32 %v698_v48, %v852_v9 }
 0x481   : > { %v866_v11 = vmul.f32 1.442695, %v862_v10 }
 0x483   : > { %1707 = vpow2.f32 %v866_v11 }
 0x48d   : > { %v1708_v12 = vpop.eup %1707 }
 0x48e   : > { %v874_v13 = vsel %vm656_vm4, %v1708_v12, 0.0 }
 0x497   : > { %875 = vadd.xlane.f32.xlu1 %v874_v13 }
 0x4eb   : > { %v855_v14 = vpop.xlane.xlu0 %854 }
 0x4ec   : > { %v863_v15 = vsub.f32 %v747_v54, %v855_v14 }
 0x4ee   : > { %v868_v16 = vmul.f32 1.442695, %v863_v15 }
 0x4ef   : > { %v858_v17 = vpop.xlane.xlu1 %857 }
 0x4f0   : > { %1709 = vpow2.f32 %v868_v16  ;;  %v864_v18 = vsub.f32 %v796_v60, %v858_v17  ;;  %v1502_v16 = vld [vmem:[#allocation4] ss:$0 sm:$0xff] }
 0x4f2   : > { %v870_v19 = vmul.f32 1.442695, %v864_v18 }
 0x4f3   : > { %v899_v20 = vpop.permute.xlu1 %898  ;;  %v861_v21 = vpop.xlane.xlu0 %860 }
 0x4f4   : > { %1711 = vpow2.f32 %v870_v19  ;;  %v905_v22 = vsel %vm903_vm5, %v899_v20, 0  ;;  %v865_v23 = vsub.f32 %v845_v3, %v861_v21 }
 0x4f5   : > { %1583 = vmatpush3.bf16.msra.mxu1 %v905_v22 }
 0x4f6   : > { %v872_v24 = vmul.f32 1.442695, %v865_v23  ;;  %1594 = vmatprep.subr.bf16.mxu1 %v1863_v8 }
 0x4f8   : > { %1713 = vpow2.f32 %v872_v24 }
 0x4fa   : > { %v1710_v25 = vpop.eup %1709 }
 0x4fb   : > { %v877_v26 = vsel %vm656_vm4, %v1710_v25, 0.0 }
 0x4fc   : > { %878 = vadd.xlane.f32.xlu0 %v877_v26 }
 0x4fe   : > { %v1712_v27 = vpop.eup %1711 }
 0x4ff   : > { %v880_v28 = vsel %vm656_vm4, %v1712_v27, 0.0 }
 0x500   : > { %881 = vadd.xlane.f32.xlu1 %v880_v28 }
 0x502   : > { %v1714_v29 = vpop.eup %1713 }
 0x503   : > { %v883_v30 = vsel %vm656_vm4, %v1714_v29, 0.0 }
 0x504   : > { %884 = vadd.xlane.f32.xlu0 %v883_v30  ;;  %v1699_v30 = vld [vmem:[%s2264_s12] sm:$0xff]  }
 0x511   : > { %995 = vrot.lane.b32.xlu1 %v2130_v35, %s1869_s18 }
 0x515   : > { %1043 = vrot.lane.b32.xlu1 %v2133_v38, %s1869_s18 }
 0x51a   : > { %947 = vrot.lane.b32.xlu0 %v2127_v33, %s1869_s18 }
 0x524   : > { %v876_v31 = vpop.xlane.xlu1 %875 }
 0x525   : > { %1715 = vrcp.f32 %v876_v31  ;;  %v1700_v31 = vld [vmem:[%s2264_s12 + $0x8] sm:$0xff]  }
 0x52f   : > { %v1716_v32 = vpop.eup %1715 }
 0x530   : > { %v890_v34 = vmul.f32 %v1716_v32, %v1708_v12 }
 0x532   : > { %v894_v36 = vpack.c.bf16 %v890_v34, %v890_v34 }
 0x534   : > { %1585 = vmatmul.mubr.msk.bf16.vlgmr.msra.gmra.mrb[8].mxu1 %vm656_vm4, %v894_v36 }
 0x535   : > { %1596 = vmatprep.mubr.msk.bf16.mxu1 %vm1864_vm1, %v1863_v8 }
 0x589   : > { %v879_v37 = vpop.xlane.xlu0 %878 }
 0x58a   : > { %1717 = vrcp.f32 %v879_v37 }
 0x58d   : > { %v882_v39 = vpop.xlane.xlu1 %881 }
 0x58e   : > { %1719 = vrcp.f32 %v882_v39 }
 0x591   : > { %v996_v35 = vpop.permute.xlu1 %995  ;;  %v885_v40 = vpop.xlane.xlu0 %884 }
 0x592   : > { %v1001_v38 = vsel %vm903_vm5, %v996_v35, 0  ;;  %1721 = vrcp.f32 %v885_v40 }
 0x593   : > { %1595 = vmatpush3.bf16.msra.mxu1 %v1001_v38 }
 0x594   : > { %v1718_v33 = vpop.eup %1717  ;;  %1606 = vmatprep.subr.bf16.mxu1 %v1863_v8 }
 0x595   : > { %v891_v41 = vmul.f32 %v1718_v33, %v1710_v25  ;;  %v948_v42 = vpop.permute.xlu0 %947  ;;  %v1044_v44 = vpop.permute.xlu1 %1043  ;;  %v1506_v33 = vld [vmem:[%s2260_s8] ss:$0 sm:$0xff] }
 0x596   : > { %v953_v43 = vsel %vm903_vm5, %v948_v42, 0  ;;  %v1049_v48 = vsel %vm903_vm5, %v1044_v44, 0 }
 0x597   : > { %1589 = vmatpush3.bf16.msra.mxu0 %v953_v43  ;;  %v895_v45 = vpack.c.bf16 %v891_v41, %v891_v41  ;;  %v1507_v43 = vld [vmem:[%s2261_s9] ss:$0 sm:$0xff] }
 0x598   : > { %v1720_v46 = vpop.eup %1719  ;;  %1600 = vmatprep.subr.bf16.mxu0 %v1863_v8 }
 0x599   : > { %v892_v47 = vmul.f32 %v1720_v46, %v1712_v27 }
 0x59a   : > { %1591 = vmatmul.mubr.msk.bf16.vlgmr.msra.gmra.mrb[12].mxu0 %vm656_vm4, %v895_v45 }
 0x59b   : > { %1601 = vmatpush3.bf16.msra.mxu0 %v1049_v48  ;;  %v896_v49 = vpack.c.bf16 %v892_v47, %v892_v47  ;;  %1602 = vmatprep.mubr.msk.bf16.mxu0 %vm1864_vm1, %v1863_v8  ;;  %v1701_v47 = vld [vmem:[%s2264_s12 + $0x10] sm:$0xff]   ;;  %v1702_v48 = vld [vmem:[%s2264_s12 + $0x18] sm:$0xff]  }
 0x59c   : > { %v1722_v50 = vpop.eup %1721  ;;  %1614 = vmatprep.subr.bf16.mxu0 %v1863_v8 }
 0x59d   : > { %v893_v51 = vmul.f32 %v1722_v50, %v1714_v29  ;;  %1597 = vmatmul.mubr.msk.bf16.vlgmr.msra.gmra.mrb[12].mxu1 %vm656_vm4, %v896_v49  ;;  %v1697_v29 = vld [vmem:[%s2262_s10] sm:$0xff]  }
 0x59e   : > { %1610 = vmatprep.mubr.msk.bf16.mxu1 %vm1864_vm1, %v1863_v8  ;;  %1607 = vmatpush3.bf16.msra.mxu1 %v1695_v57  ;;  %v1508_v49 = vld [vmem:[#allocation6] ss:$0 sm:$0xff]  ;;  %v1512_v57 = vld [vmem:[#allocation7] ss:$0 sm:$0xff] }
 0x59f   : > { %v897_v52 = vpack.c.bf16 %v893_v51, %v893_v51  ;;  %1608 = vmatprep.subr.bf16.mxu1 %v1863_v8 }
 0x5a2   : > { %1603 = vmatmul.mubr.msk.bf16.vlgmr.msra.gmra.mrb[16].mxu0 %vm656_vm4, %v897_v52  ;;  %1609 = vmatpush3.bf16.msra.mxu1 %v1696_v58 }
 0x5a3   : > { %1618 = vmatprep.mubr.msk.bf16.mxu0 %vm1864_vm1, %v1863_v8  ;;  %1622 = vmatprep.subr.bf16.mxu1 %v1863_v8 }
 0x5a4   : > { %1615 = vmatpush3.bf16.msra.mxu0 %v1697_v29 }
 0x5a5   : > { %1616 = vmatprep.subr.bf16.mxu0 %v1863_v8 }
 0x607   : > { %v941_v53 = vpop.f32.mrb[8].mxu1 }
 0x608   : > { %v1586_v54 = vpop.f32.mrb[9].mxu1 }
 0x609   : > { %v944_v55 = vpop.f32.mrb[10].mxu1 }
 0x60a   : > { %v1587_v56 = vpop.f32.mrb[11].mxu1 }
 0x66d   : > { %v989_v59 = vpop.f32.mrb[12].mxu0 }
 0x66e   : > { %1092 = vrot.lane.b32.xlu0 %v989_v59, %s1870_s20  ;;  %v1592_v60 = vpop.f32.mrb[13].mxu0 }
 0x66f   : > { %v992_v61 = vpop.f32.mrb[14].mxu0 }
 0x670   : > { %v1593_v62 = vpop.f32.mrb[15].mxu0  ;;  %v1037_v63 = vpop.f32.mrb[12].mxu1 }
 0x671   : > { %1096 = vrot.lane.b32.xlu1 %v1037_v63, %s1871_s23  ;;  %v1598_v1 = vpop.f32.mrb[13].mxu1 }
 0x672   : > { %v1040_v2 = vpop.f32.mrb[14].mxu1 }
 0x673   : > { %v1599_v3 = vpop.f32.mrb[15].mxu1 }
 0x675   : > { %v1085_v4 = vpop.f32.mrb[16].mxu0 }
 0x676   : > { %1100 = vrot.lane.b32.xlu0 %v1085_v4, %s1872_s25  ;;  %v1604_v5 = vpop.f32.mrb[17].mxu0 }
 0x677   : > { %v1088_v6 = vpop.f32.mrb[18].mxu0 }
 0x678   : > { %v1605_v7 = vpop.f32.mrb[19].mxu0 }
 0x6e0   : > { %v1093_v9 = vpop.permute.xlu0 %1092 }
 0x6e1   : > { %v1103_v11 = vsel %vm656_vm4, %v941_v53, %v1093_v9 }
 0x6e3   : > { %v1097_v10 = vpop.permute.xlu1 %1096 }
 0x6e4   : > { %v1105_v12 = vsel %vm1104_vm6, %v1103_v11, %v1097_v10 }
 0x6e8   : > { %v1101_v13 = vpop.permute.xlu0 %1100 }
 0x6e9   : > { %v1107_v14 = vsel %vm1106_vm7, %v1105_v12, %v1101_v13 }
 0x6ea   : > { %v1108_v15 = vpack.c.bf16 %v1107_v14, %v1107_v14 }
 0x6ec   : > { %1611 = vmatmul.mubr.msk.bf16.vlgmr.msra.gmra.mrb[16].mxu1 %vm535_vm0, %v1108_v15 }
 0x6ed   : > { %1630 = vmatprep.mubr.msk.bf16.mxu1 %vm1864_vm1, %v1863_v8  ;;  %1623 = vmatpush3.bf16.msra.mxu1 %v1699_v30 }
 0x6ee   : > { %1624 = vmatprep.subr.bf16.mxu1 %v1863_v8 }
 0x6f1   : > { %1625 = vmatpush3.bf16.msra.mxu1 %v1700_v31 }
 0x6f2   : > { %1626 = vmatprep.subr.bf16.mxu1 %v1863_v8 }
 0x6f5   : > { %1627 = vmatpush3.bf16.msra.mxu1 %v1701_v47 }
 0x6f6   : > { %1628 = vmatprep.subr.bf16.mxu1 %v1863_v8 }
 0x6f9   : > { %1629 = vmatpush3.bf16.msra.mxu1 %v1702_v48 }
 0x7bf   : > { %v1169_v17 = vpop.f32.mrb[16].mxu1 }
 0x7c0   : > { %v1170_v18 = vadd.f32 %v1502_v16, %v1169_v17  ;;  %v1612_v19 = vpop.f32.mrb[17].mxu1 }
 0x7c1   : > { %v1172_v20 = vpop.f32.mrb[18].mxu1 }
 0x7c2   : > { %v1175_v21 = vadd.f32 %v1170_v18, %v2095_v0  ;;  %v1613_v22 = vpop.f32.mrb[19].mxu1  ;;  %v1698_v0 = vld [vmem:[%s2262_s10 + $0x8] sm:$0xff]  }
 0x7c3   : > { %1617 = vmatpush3.bf16.msra.mxu0 %v1698_v0 }
 0x7c4   : > { %v1178_v23 = vsel %vm535_vm0, %v1175_v21, 0.0 }
 0x7c5   : > { %1179 = vadd.xlane.f32.xlu1 %v1178_v23 }
 0x852   : > { %v1180_v24 = vpop.xlane.xlu1 %1179 }
 0x853   : > { %v1181_v25 = vmul.f32 0.03125, %v1180_v24 }
 0x855   : > { %v1182_v26 = vsub.f32 %v1175_v21, %v1181_v25 }
 0x857   : > { %v1183_v27 = vmul.f32 %v1182_v26, %v1182_v26  ;;  %v1203_v41 = vmul.f32 %v1506_v33, %v1182_v26 }
 0x859   : > { %v1184_v28 = vsel %vm535_vm0, %v1183_v27, 0.0 }
 0x85a   : > { %1185 = vadd.xlane.f32.xlu0 %v1184_v28 }
 0x8e7   : > { %v1186_v32 = vpop.xlane.xlu0 %1185 }
 0x8e8   : > { %v1187_v34 = vmul.f32 0.032258064, %v1186_v32 }
 0x8ea   : > { %1723 = vrsqrt.f32 %v1187_v34  ;;  %vm1190_vm8 = vcmp.eq.f32.partialorder %v1187_v34, inf  ;;  %v1193_v39 = vand.u32 2147483648, %v1187_v34  ;;  %vm1192_vm9 = vcmp.eq.f32.partialorder %v1187_v34, 0.0 }
 0x8f4   : > { %v1724_v36 = vpop.eup %1723 }
 0x8f5   : > { %v1189_v37 = vmul.f32 %v1724_v36, %v1187_v34 }
 0x8f7   : > { %v1191_v35 = vsel %vm1190_vm8, %v1187_v34, %v1189_v37 }
 0x8f8   : > { %v1194_v40 = vsel %vm1192_vm9, %v1193_v39, %v1191_v35 }
 0x8f9   : > { %v1195_v38 = vadd.f32 1e-06, %v1194_v40 }
 0x8fb   : > { %1725 = vrcp.f32 %v1195_v38 }
 0x905   : > { %v1726_v42 = vpop.eup %1725 }
 0x906   : > { %v1204_v44 = vmul.f32 %v1726_v42, %v1203_v41 }
 0x908   : > { %v1211_v45 = vadd.f32 %v1507_v43, %v1204_v44 }
 0x90a   : > { %v1212_v46 = vpack.c.bf16 %v1211_v45, %v1211_v45 }
 0x90c   : > { %1619 = vmatmul.mubr.msk.bf16.vlgmr.msra.gmra.mrb[20].mxu0 %vm535_vm0, %v1212_v46 }
 0x9df   : > { %v1273_v50 = vpop.f32.mrb[20].mxu0 }
 0x9e0   : > { %v1274_v51 = vadd.f32 %v1508_v49, %v1273_v50  ;;  %v1620_v52 = vpop.f32.mrb[21].mxu0 }
 0x9e1   : > { %v1276_v53 = vpop.f32.mrb[22].mxu0 }
 0x9e2   : > { %v1279_v54 = vmax.f32 %v1274_v51, 0.0  ;;  %v1621_v55 = vpop.f32.mrb[23].mxu0 }
 0x9e4   : > { %v1280_v56 = vpack.c.bf16 %v1279_v54, %v1279_v54 }
 0x9e6   : > { %1631 = vmatmul.mubr.msk.bf16.vlgmr.msra.gmra.mrb[20].mxu1 %vm1320_vm10, %v1280_v56 }
 0xab9   : > { %v1358_v58 = vpop.f32.mrb[20].mxu1 }
 0xaba   : > { %v1359_v59 = vadd.f32 %v1512_v57, %v1358_v58  ;;  %v1632_v8 = vpop.f32.mrb[21].mxu1 }
 0xabb   : > { %v1361_v60 = vpop.f32.mrb[22].mxu1 }
 0xabc   : > { %v1364_v61 = vadd.f32 %v1359_v59, %v1175_v21  ;;  %v1633_v62 = vpop.f32.mrb[23].mxu1 }
 0xabe   : > { %1365 = vst.msk [vmem:[%s530_s19] sm:$0xff] %vm535_vm0, %v1364_v61 }
 0xabf PF: > { %s2283_s14 = sld [smem:[#allocation12_spill]] }
 0xac5   : > { %s27_s29 = sadd.s32 1, %s2283_s14  }
 0xac6   : > { %p24_p11 = scmp.ge.s32.totalorder %s27_s29, 4  }
 0xac8   :  { %26 = sbr.rel (!%p24_p11) target bundleno = 5 (0x5), region = 126 }
 0xacf   :  { %1385 = vsyncpa [#allocation3], 1 }
 0xad0   :  { %1387 = vsyncpa [#allocation3 + $0x1], 1 }
 0xad1   :  { %1388 = vsyncpa [#allocation5], 1 }
 0xad2   :  { %1389 = vsyncpa [#allocation8], 1 }

</bundles_post_ra>
